<compile_context>
chip_gen: v7x
topology: tpu7x:2x2x1
jax: 0.10.0
libtpu: 0.0.40
codegen_flags: <defaults>
</compile_context>

<pallas_src>
import functools

import jax
import jax.numpy as jnp
from jax import lax
from jax.experimental import pallas as pl
from jax.experimental.pallas import tpu as pltpu


def _round_up(x, m):
    return (x + m - 1) // m * m


def _decoder_kernel(x_ref, m_ref, w_ref, prev_ref, o_ref, *, K, half2, need_mask):
    """One (batch, frame-tile) grid step.

    x_ref, m_ref : (1, N, tk)       mixture / mask block, frames on the lane axis
    w_ref        : (2*half2, N)     [W[:L/2] ; W[L/2:]], each padded to half2 rows
    prev_ref     : (1, half2, 128)  lane 0 = 2nd half of the frame preceding this tile
    o_ref        : (1, half2, tk)   overlap-added sub-frames (lane dense)
    """
    kt = pl.program_id(1)
    tk = o_ref.shape[2]

    est = x_ref[0] * m_ref[0]                                      # (N, tk)

    # Single fused MXU matmul: rows [0:half2) are the frame first halves,
    # rows [half2:2*half2) the second halves; f32 accumulation.
    proj = jnp.dot(w_ref[...], est, preferred_element_type=jnp.float32)

    if need_mask:
        # Only emitted when the last tile is partial: zero columns of frames
        # >= K (their input data is undefined block padding).  Post-matmul the
        # select is over (2*half2, tk), far cheaper than masking `est`.
        frame = kt * tk + lax.broadcasted_iota(jnp.int32, (1, tk), 1)
        proj = jnp.where(frame < K, proj, 0.0)

    first = proj[:half2]                                           # (half2, tk)
    second = proj[half2:]                                          # (half2, tk)
    prev = prev_ref[0][:, 0:1]                                     # (half2, 1)

    if tk % 128 == 0:
        # Shift `second` right by one lane (XLU roll, off the VPU critical path)
        # and inject the wrapper-computed boundary column at lane 0.
        rolled = pltpu.roll(second, shift=1, axis=1)
        lane = lax.broadcasted_iota(jnp.int32, (half2, tk), 1)
        shifted = jnp.where(lane == 0, prev, rolled)
    else:
        # Single full-extent tile with an unaligned width: explicit shift.
        shifted = jnp.concatenate([prev, second[:, :tk - 1]], axis=1)

    o_ref[0] = (first + shifted).astype(o_ref.dtype)


def decoder_forward(mixture_w, est_mask, basis_weight, *, frame_tile=2048,
                    input_vmem_budget_bytes=24 << 20):
    """mixture_w, est_mask: [B, N, K]; basis_weight: [L, N] (nn.Linear weight)."""
    B, N, K = mixture_w.shape
    L, N_w = basis_weight.shape
    assert N_w == N
    assert L % 2 == 0
    half = L // 2
    half2 = _round_up(half, 8)                       # sublane-aligned row count
    out_dtype = jnp.result_type(mixture_w.dtype, est_mask.dtype, basis_weight.dtype)
    xb = mixture_w.dtype.itemsize
    mb = est_mask.dtype.itemsize
    wb = basis_weight.dtype.itemsize
    ob = jnp.dtype(out_dtype).itemsize

    # --- frame-axis tiling: biggest lane-aligned tile that fits the VMEM budget.
    max_tk = max(128, (input_vmem_budget_bytes // (2 * N * (xb + mb))) // 128 * 128)
    tile = max(128, min(frame_tile, max_tk) // 128 * 128)
    if K <= tile:
        tk, nt = K, 1            # one full-extent tile, no alignment constraint
    else:
        tk, nt = tile, pl.cdiv(K, tile)
    need_mask = (nt * tk != K)   # last tile partial -> mask frames >= K in-kernel
    tail_needed = not need_mask  # sub-frame K not produced by any tile (K % tk == 0)
    n_sub_kernel = nt * tk

    # --- tiny wrapper projections: per-tile boundary columns (second half of
    # frame kt*tk - 1) and, when needed, the final half-frame.  This removes the
    # cross-tile carry so both grid axes can be marked "parallel".
    w_second = basis_weight[half:]                                   # (half, N)
    cols_x = mixture_w[:, :, tk - 1::tk]                             # (B, N, n_b)
    cols_m = est_mask[:, :, tk - 1::tk]
    proj_b = jnp.einsum("ln,bnc->blc", w_second, cols_x * cols_m,
                        preferred_element_type=jnp.float32)          # (B, half, n_b)

    # Lane-aligned prev layout: one 128-wide block per tile, value at lane 0.
    prev_cols = jnp.zeros((B, half2, nt, 128), jnp.float32)
    if nt > 1:
        prev_cols = prev_cols.at[:, :half, 1:, 0].set(proj_b[:, :, :nt - 1])
    prev_cols = prev_cols.reshape(B, half2, nt * 128)

    # Fused, sublane-padded basis weight: [W_first ; W_second] -> (2*half2, N).
    w_all = jnp.zeros((2 * half2, N), basis_weight.dtype)
    w_all = w_all.at[:half, :].set(basis_weight[:half])
    w_all = w_all.at[half2:half2 + half, :].set(basis_weight[half:])

    # Raise the scoped-VMEM limit so the big double-buffered tiles fit on v5e
    # (16 MiB default) as well as v6e/v7x; stay well under v7x's 64 MiB physical.
    vmem_need = (2 * (N * tk * (xb + mb) + half2 * tk * ob + half2 * 128 * 4)
                 + 2 * half2 * N * wb)
    vmem_limit = int(min(max(2 * vmem_need, 32 << 20), 48 << 20))

    kernel = functools.partial(_decoder_kernel, K=K, half2=half2, need_mask=need_mask)

    cost = pl.CostEstimate(
        flops=2 * B * K * N * L + B * N * K,
        transcendentals=0,
        bytes_accessed=(B * N * K * (xb + mb) + 2 * half2 * N * wb
                        + B * half2 * n_sub_kernel * ob),
    )

    out_sub = pl.pallas_call(
        kernel,
        out_shape=jax.ShapeDtypeStruct((B, half2, n_sub_kernel), out_dtype),
        grid=(B, nt),
        in_specs=[
            pl.BlockSpec((1, N, tk), lambda b, kt: (b, 0, kt)),
            pl.BlockSpec((1, N, tk), lambda b, kt: (b, 0, kt)),
            pl.BlockSpec((2 * half2, N), lambda b, kt: (0, 0)),
            pl.BlockSpec((1, half2, 128), lambda b, kt: (b, 0, kt)),
        ],
        out_specs=pl.BlockSpec((1, half2, tk), lambda b, kt: (b, 0, kt)),
        compiler_params=pltpu.CompilerParams(
            dimension_semantics=("parallel", "parallel"),
            vmem_limit_bytes=vmem_limit),
        cost_estimate=cost,
    )(mixture_w, est_mask, w_all, prev_cols)

    # Assemble the K+1 sub-frames and flatten to [B, (K-1)*L//2 + L].
    if tail_needed:
        tail = proj_b[:, :, nt - 1].astype(out_dtype)                 # (B, half)
        cols = jnp.concatenate([out_sub[:, :half, :K], tail[:, :, None]], axis=2)
    else:
        cols = out_sub[:, :half, :K + 1]
    return jnp.transpose(cols, (0, 2, 1)).reshape(B, (K + 1) * half)


def decoder_reference(mixture_w, est_mask, basis_weight):
    """Pure-JAX reference mirroring the PyTorch module."""
    L = basis_weight.shape[0]
    half = L // 2
    est = mixture_w * est_mask                       # [B, N, K]
    est = jnp.transpose(est, (0, 2, 1))              # [B, K, N]
    frames = est @ basis_weight.T                    # [B, K, L]
    B, K, _ = frames.shape
    out = jnp.zeros((B, K + 1, half), jnp.float32)
    out = out.at[:, :K].add(frames[:, :, :half])
    out = out.at[:, 1:].add(frames[:, :, half:])
    return out.reshape(B, -1)


if __name__ == "__main__":
    key = jax.random.PRNGKey(0)

    def make_inputs(case_key, B, N, K, L, dtype):
        k1, k2, k3 = jax.random.split(case_key, 3)
        mixture_w = jax.random.normal(k1, (B, N, K), dtype=jnp.float32)
        est_mask = jax.nn.sigmoid(jax.random.normal(k2, (B, N, K), dtype=jnp.float32))
        # nn.Linear(N, L, bias=False).weight has shape [L, N].
        basis_weight = jax.random.normal(k3, (L, N), dtype=jnp.float32) / jnp.sqrt(N)
        return (mixture_w.astype(dtype), est_mask.astype(dtype),
                basis_weight.astype(dtype))

    # (B, N, K, L, frame_tile, dtype, tol): covers single unaligned full-extent
    # tile, lane-aligned roll path, multi-tile with a partial edge tile (mask),
    # multi-tile with K % tile == 0 (wrapper boundary + tail), and bf16 inputs.
    cases = [
        (2, 32, 16, 8, 2048, jnp.float32, 1e-3),
        (2, 32, 200, 8, 2048, jnp.float32, 1e-3),
        (2, 32, 200, 8, 128, jnp.float32, 1e-3),
        (1, 32, 256, 8, 128, jnp.float32, 1e-3),
        (1, 32, 256, 8, 2048, jnp.float32, 1e-3),
        (2, 32, 200, 8, 2048, jnp.bfloat16, 5e-2),
    ]
    keys = jax.random.split(key, len(cases))
    for case_key, (B, N, K, L, ft, dtype, tol) in zip(keys, cases):
        mixture_w, est_mask, basis_weight = make_inputs(case_key, B, N, K, L, dtype)
        fwd = jax.jit(functools.partial(decoder_forward, frame_tile=ft))
        out = jax.block_until_ready(fwd(mixture_w, est_mask, basis_weight))
        ref = decoder_reference(mixture_w.astype(jnp.float32),
                                est_mask.astype(jnp.float32),
                                basis_weight.astype(jnp.float32))
        assert out.shape == (B, (K - 1) * (L // 2) + L), (out.shape, (B, K, L))
        assert jnp.allclose(out.astype(jnp.float32), ref, atol=tol, rtol=tol), \
            f"mismatch for {(B, N, K, L, ft, jnp.dtype(dtype).name)}"

    print("KERNEL_OK")
</pallas_src>

<mosaic_0001>
module attributes {stable_mosaic.version = 11 : i64} {
  func.func @_decoder_kernel(%arg0: i32, %arg1: i32, %arg2: memref<1x32x16xf32, #tpu.memory_space<vmem>>, %arg3: memref<1x32x16xf32, #tpu.memory_space<vmem>>, %arg4: memref<16x32xf32, #tpu.memory_space<vmem>>, %arg5: memref<1x8x128xf32, #tpu.memory_space<vmem>>, %arg6: memref<1x8x16xf32, #tpu.memory_space<vmem>>) attributes {dimension_semantics = [#tpu.dimension_semantics<parallel>, #tpu.dimension_semantics<parallel>], iteration_bounds = array<i64: 2, 1>, scalar_prefetch = 0 : i64, scratch_operands = 0 : i64, tpu.core_type = #tpu.core_type<tc>, window_params = [{transform_indices = @transform_0, window_bounds = array<i64: 1, 32, 16>}, {transform_indices = @transform_1, window_bounds = array<i64: 1, 32, 16>}, {pipeline_mode = #tpu.pipeline_mode<synchronous>, transform_indices = @transform_2, window_bounds = array<i64: 16, 32>}, {transform_indices = @transform_3, window_bounds = array<i64: 1, 8, 128>}, {transform_indices = @transform_4, window_bounds = array<i64: 1, 8, 16>}]} {
    %c0 = arith.constant 0 : index
    %c0_0 = arith.constant 0 : index
    %c0_1 = arith.constant 0 : index
    %0 = vector.load %arg2[%c0, %c0_0, %c0_1] : memref<1x32x16xf32, #tpu.memory_space<vmem>>, vector<1x32x16xf32>
    %1 = vector.shape_cast %0 : vector<1x32x16xf32> to vector<32x16xf32>
    %c0_2 = arith.constant 0 : index
    %c0_3 = arith.constant 0 : index
    %c0_4 = arith.constant 0 : index
    %2 = vector.load %arg3[%c0_2, %c0_3, %c0_4] : memref<1x32x16xf32, #tpu.memory_space<vmem>>, vector<1x32x16xf32>
    %3 = vector.shape_cast %2 : vector<1x32x16xf32> to vector<32x16xf32>
    %4 = arith.mulf %1, %3 : vector<32x16xf32>
    %c0_5 = arith.constant 0 : index
    %c0_6 = arith.constant 0 : index
    %5 = vector.load %arg4[%c0_5, %c0_6] : memref<16x32xf32, #tpu.memory_space<vmem>>, vector<16x32xf32>
    %cst = arith.constant dense<0.000000e+00> : vector<16x16xf32>
    %6 = tpu.matmul %5, %4, %cst {dimension_numbers = #tpu.dot_dimension_numbers<[1], [0], [0], [1], [0, 0, 1, 1], [], []>} : vector<16x32xf32>, vector<32x16xf32>, vector<16x16xf32> -> vector<16x16xf32>
    %7 = vector.extract_strided_slice %6 {offsets = [0, 0], sizes = [8, 16], strides = [1, 1]} : vector<16x16xf32> to vector<8x16xf32>
    %8 = vector.extract_strided_slice %6 {offsets = [8, 0], sizes = [8, 16], strides = [1, 1]} : vector<16x16xf32> to vector<8x16xf32>
    %c0_7 = arith.constant 0 : index
    %c0_8 = arith.constant 0 : index
    %c0_9 = arith.constant 0 : index
    %9 = vector.load %arg5[%c0_7, %c0_8, %c0_9] : memref<1x8x128xf32, #tpu.memory_space<vmem>>, vector<1x8x128xf32>
    %10 = vector.shape_cast %9 : vector<1x8x128xf32> to vector<8x128xf32>
    %11 = vector.extract_strided_slice %10 {offsets = [0, 0], sizes = [8, 1], strides = [1, 1]} : vector<8x128xf32> to vector<8x1xf32>
    %12 = vector.extract_strided_slice %8 {offsets = [0, 0], sizes = [8, 15], strides = [1, 1]} : vector<8x16xf32> to vector<8x15xf32>
    %13 = tpu.concatenate %11, %12 in 1 : vector<8x1xf32>, vector<8x15xf32> -> vector<8x16xf32>
    %14 = arith.addf %7, %13 : vector<8x16xf32>
    %c0_10 = arith.constant 0 : index
    %c0_11 = arith.constant 0 : index
    %c0_12 = arith.constant 0 : index
    %15 = vector.load %arg6[%c0_10, %c0_11, %c0_12] : memref<1x8x16xf32, #tpu.memory_space<vmem>>, vector<1x8x16xf32>
    %16 = vector.shape_cast %15 : vector<1x8x16xf32> to vector<8x16xf32>
    %17 = vector.shape_cast %14 : vector<8x16xf32> to vector<1x8x16xf32>
    tpu.vector_store %arg6[%c0_10, %c0_11, %c0_12], %17 {strides = array<i32>} : memref<1x8x16xf32, #tpu.memory_space<vmem>>, vector<1x8x16xf32>,
    return
  }
  func.func @transform_0(%arg0: i32, %arg1: i32) -> (i32, i32, i32) {
    %c0_i32 = arith.constant 0 : i32
    %c0_i32_0 = arith.constant 0 : i32
    return %arg0, %c0_i32, %arg1 : i32, i32, i32
  }
  func.func @transform_1(%arg0: i32, %arg1: i32) -> (i32, i32, i32) {
    %c0_i32 = arith.constant 0 : i32
    %c0_i32_0 = arith.constant 0 : i32
    return %arg0, %c0_i32, %arg1 : i32, i32, i32
  }
  func.func @transform_2(%arg0: i32, %arg1: i32) -> (i32, i32) {
    %c0_i32 = arith.constant 0 : i32
    %c0_i32_0 = arith.constant 0 : i32
    %c0_i32_1 = arith.constant 0 : i32
    return %c0_i32, %c0_i32_0 : i32, i32
  }
  func.func @transform_3(%arg0: i32, %arg1: i32) -> (i32, i32, i32) {
    %c0_i32 = arith.constant 0 : i32
    %c0_i32_0 = arith.constant 0 : i32
    return %arg0, %c0_i32, %arg1 : i32, i32, i32
  }
  func.func @transform_4(%arg0: i32, %arg1: i32) -> (i32, i32, i32) {
    %c0_i32 = arith.constant 0 : i32
    %c0_i32_0 = arith.constant 0 : i32
    return %arg0, %c0_i32, %arg1 : i32, i32, i32
  }
}

</mosaic_0001>

<bundles_post_ra>
// kernel: decoder_forward.1
= control target key start
LH: loop header
LB: loop body
LE: loop exit
PB: predicated region body
PF: predicated region fallthrough
CT: control target
= control target key end

     0   :  { %s619_s15 = smov 0   ;;  %s621_s16 = smov 0   ;;  %s670_s0 = inlined_call_operand.vmem [shape: f32[2,32,16], index: 0, kind: input, shape index: {}]   ;;  %s671_s1 = inlined_call_operand.vmem [shape: f32[2,32,16], index: 1, kind: input, shape index: {}]   ;;  %s672_s2 = inlined_call_operand.vmem [shape: f32[16,32], index: 2, kind: input, shape index: {}]   ;;  %s673_s3 = inlined_call_operand.vmem [shape: f32[2,8,128], index: 3, kind: input, shape index: {}]   ;;  %s674_s4 = inlined_call_operand.vmem [shape: f32[2,8,16], index: 4, kind: output, shape index: {}]  }
   0x1   :  { %s623_s17 = smov 0  }
   0x2 LB: > { %s26_s18 = sadd.s32 1, %s587_s16  ;;  %p506_p0 = scmp.ge.s32.totalorder %s591_s17, 1  ;;  %s591_s17 = sphi %s623_s17, %s14_s17   ;;  %s587_s16 = sphi %s621_s16, %s676_s16   ;;  %s583_s15 = sphi %s619_s15, %s675_s15  }
   0x3   : > { %p28_p1 = scmp.ge.s32.totalorder %s26_s18, 2  ;;  %p210_p2 = scmp.lt.s32.totalorder %s591_s17, 3 }
   0x5   : > { %s678_s18 = smov (%p28_p1, %s26_s18), 0  ;;  %p211_p3 = pnand %p506_p0, %p210_p2 }
   0x6   : > { %p256_p4 = scmp.lt.s32.totalorder (!%p211_p3), %s583_s15, 1  ;;  %v298_v0 = vld [vmem:[%s672_s2] sm:$0xff] (!%p211_p3)  ;;  %vm300_vm0 = vcmask (!%p211_p3), 261120   ;;  %v299_v15 = vld [vmem:[%s672_s2 + $0x8] sm:$0xff] (!%p211_p3)  ;;  %s593_s30 = smov (!%p211_p3), 1   ;;  %vm387_vm1 = vcmask (!%p211_p3), 7168  }
   0x7   : > { %214 = sbr.rel (%p211_p3) target bundleno = 362 (0x16a), region = 36  ;;  %533 = vmatprep.mubr.msk.f32.mxu0 (!%p211_p3), %vm300_vm0, %v298_v0  ;;  %vm390_vm2 = vcmask (!%p211_p3), 130048  }
   0xe   : > { %s680_s15 = smov (!%p256_p4, %s583_s15), 1 }
   0xf   : > { %s517_s21 = sshll.u32 %s680_s15, 5  ;;  %s511_s5 = sshll.u32 %s680_s15, 3 }
  0x10   : > { %s263_s24 = scalar_lea.vmem %s670_s0, %s517_s21  ;;  %s271_s27 = scalar_lea.vmem %s671_s1, %s517_s21 }
  0x11   : > { %v286_v1 = vld [vmem:[%s263_s24] sm:$0xff]  ;;  %v287_v2 = vld [vmem:[%s263_s24 + $0x8] sm:$0xff]  ;;  %v288_v6 = vld [vmem:[%s263_s24 + $0x10] sm:$0xff]  ;;  %s278_s8 = scalar_lea.vmem %s673_s3, %s511_s5  ;;  %s285_s11 = scalar_lea.vmem %s674_s4, %s511_s5 }
  0x12   : > { %v290_v3 = vld [vmem:[%s271_s27] sm:$0xff]  ;;  %v291_v4 = vld [vmem:[%s271_s27 + $0x8] sm:$0xff]  ;;  %v289_v7 = vld [vmem:[%s263_s24 + $0x18] sm:$0xff] }
  0x13   : > { %v294_v5 = vmul.f32 %v290_v3, %v286_v1  ;;  %v295_v8 = vmul.f32 %v291_v4, %v287_v2  ;;  %v292_v9 = vld [vmem:[%s271_s27 + $0x10] sm:$0xff]  ;;  %v293_v10 = vld [vmem:[%s271_s27 + $0x18] sm:$0xff]  ;;  %v382_v18 = vld [vmem:[%s278_s8] sm:$0xff] }
  0x14   : > { %v296_v11 = vmul.f32 %v292_v9, %v288_v6  ;;  %v297_v12 = vmul.f32 %v293_v10, %v289_v7 }
  0x15   : > { %v536_v13 = vpack.c.bf16 %v295_v8, %v294_v5 }
  0x16   : > { %v540_v14 = vpack.c.bf16 %v297_v12, %v296_v11 }
  0x17   : > { %537 = vmatprep.subr.bf16.mxu0 %v536_v13 }
  0x18   : > { %539 = vmatpush3.bf16.msra.mxu0 %v536_v13 }
  0x19   : > { %541 = vmatprep.subr.bf16.mxu0 %v540_v14 }
  0x1c   : > { %543 = vmatpush3.bf16.msra.mxu0 %v540_v14 }
  0x1f   : > { %534 = vmatmul.mubr.msk.f32.vlgmr.msra.gmra.mrb[0].mxu0 %vm300_vm0, %v299_v15 }
  0xf2   : > { %v535_v16 = vpop.f32.mrb[0].mxu0 }
  0xf3   : > { %v373_v17 = vpop.f32.mrb[1].mxu0  ;;  %384 = vrot.lane.b32.xlu0 %v535_v16, %s593_s30 }
 0x165   : > { %v385_v19 = vpop.permute.xlu0 %384 }
 0x166   : > { %v388_v20 = vsel %vm387_vm1, %v382_v18, %v385_v19 }
 0x167   : > { %v389_v21 = vadd.f32 %v388_v20, %v373_v17 }
 0x169   : > { %391 = vst.msk [vmem:[%s285_s11] sm:$0xff] %vm390_vm2, %v389_v21 }
 0x16a PF: > { %s14_s17 = sadd.s32 1, %s591_s17   ;;  %s675_s15 = smov %s587_s16 }
 0x16b   : > { %p11_p5 = scmp.ge.s32.totalorder %s14_s17, 4   ;;  %s676_s16 = smov %s678_s18 }
 0x16d   :  { %13 = sbr.rel (!%p11_p5) target bundleno = 2 (0x2), region = 72 }

</bundles_post_ra>
